<compile_context>
chip_gen: v7x
topology: tpu7x:2x2x1
jax: 0.10.0
libtpu: 0.0.40
codegen_flags: <defaults>
</compile_context>

<pallas_src>
import functools
import math

import jax
import jax.numpy as jnp
from jax import lax
from jax.experimental import pallas as pl
from jax.experimental.pallas import tpu as pltpu


def _round_up(x, m):
    return ((x + m - 1) // m) * m


def _choose_batch_tile(b, s_size, f_size, out_dim, hidden_sizes,
                       embed_itemsize, max_tile, vmem_budget=32 * 1024 * 1024):
    """Largest multiple-of-8 batch tile that fits a conservative VMEM budget."""
    per_row = 2 * embed_itemsize * (s_size * f_size + f_size)   # d/u blocks, 2 bufs
    per_row += 2 * 4 * out_dim                                  # out block, 2 bufs
    per_row += 4 * (s_size * f_size + f_size)                   # f32 upcast of d/u
    per_row += 4 * sum(hidden_sizes)                            # f32 activations
    tb = vmem_budget // max(per_row, 1)
    tb = min(tb, max_tile, _round_up(b, 8))
    return max(8, (tb // 8) * 8)


def _response_mlp_kernel(d_ref, u_ref, *refs):
    """refs = (w1d, w1u, b1, [w_i, b_i]*, out)."""
    out_ref = refs[-1]
    params = refs[:-1]

    d = d_ref[...].astype(jnp.float32)
    u = u_ref[...].astype(jnp.float32)

    # F.normalize(x, p=2, dim=1) folded into a post-matmul per-row scale:
    #   (x / max(||x||, 1e-12)) @ W == (x @ W) * rsqrt(max(||x||^2, 1e-24))
    d_scale = lax.rsqrt(jnp.maximum(jnp.sum(d * d, axis=1, keepdims=True), 1e-24))
    u_scale = lax.rsqrt(jnp.maximum(jnp.sum(u * u, axis=1, keepdims=True), 1e-24))

    # First Linear on the (implicit) concat [dn, un].
    h = (jnp.dot(d, params[0][...], preferred_element_type=jnp.float32) * d_scale
         + jnp.dot(u, params[1][...], preferred_element_type=jnp.float32) * u_scale
         + params[2][...])

    # Remaining Linear layers: ReLU before each subsequent layer, no activation
    # after the last one (matches the PyTorch forward).
    n_rest = (len(params) - 3) // 2
    idx = 3
    for _ in range(n_rest):
        h = jnp.maximum(h, 0.0)
        w = params[idx][...]
        b = params[idx + 1][...]
        idx += 2
        h = jnp.dot(h, w, preferred_element_type=jnp.float32) + b

    out_ref[...] = h.astype(out_ref.dtype)


def user_response_mlp(slates, users, doc_embed, user_embed, mlp_params,
                      s_size, f_size, *, embed_dtype=jnp.bfloat16,
                      max_batch_tile=2048):
    """
    slates:     (B, S) int32
    users:      (B,)   int32
    doc_embed:  (maxIID+1, F) float32
    user_embed: (maxUID+1, F) float32
    mlp_params: list of (W, b), W: (in, out), b: (1, out)
    returns:    (B, S) float32
    """
    B = slates.shape[0]
    out_dim = mlp_params[-1][0].shape[1]
    hidden_sizes = [w.shape[1] for (w, _) in mlp_params]

    tb = _choose_batch_tile(B, s_size, f_size, out_dim, hidden_sizes,
                            jnp.dtype(embed_dtype).itemsize, max_batch_tile)
    b_pad = _round_up(B, tb)
    if b_pad != B:
        # Pad the (tiny) index arrays, not the gathered embeddings.
        slates = jnp.pad(slates, ((0, b_pad - B), (0, 0)))
        users = jnp.pad(users, ((0, b_pad - B),))

    # --- glue: embedding gathers (data-dependent indexing stays in JAX) ---
    # Done in `embed_dtype` (bf16 by default) to halve the dominant HBM stream.
    # TODO(synk): fold this gather into the kernel (scalar-prefetch slates +
    # DMA row gather, or allow_input_fusion) to remove the HBM round-trip.
    d_emb = jnp.take(doc_embed.astype(embed_dtype), slates, axis=0)
    d_emb = d_emb.reshape((b_pad, s_size * f_size))
    u_emb = jnp.take(user_embed.astype(embed_dtype), users, axis=0)

    # Split first layer weight for the implicit concat.
    w1, b1 = mlp_params[0]
    w1d = w1[: s_size * f_size, :]
    w1u = w1[s_size * f_size:, :]
    weight_args = [w1d, w1u, b1]
    for (w, b) in mlp_params[1:]:
        weight_args.extend([w, b])

    grid = (b_pad // tb,)
    data_specs = [
        pl.BlockSpec((tb, s_size * f_size), lambda i: (i, 0)),
        pl.BlockSpec((tb, f_size), lambda i: (i, 0)),
    ]
    # Constant index_map -> weights are DMA'd once and stay VMEM-resident.
    weight_specs = [pl.BlockSpec(w.shape, lambda i: (0, 0)) for w in weight_args]
    out_spec = pl.BlockSpec((tb, out_dim), lambda i: (i, 0))

    out = pl.pallas_call(
        _response_mlp_kernel,
        out_shape=jax.ShapeDtypeStruct((b_pad, out_dim), jnp.float32),
        grid_spec=pltpu.PrefetchScalarGridSpec(
            num_scalar_prefetch=0,
            grid=grid,
            in_specs=data_specs + weight_specs,
            out_specs=out_spec),
        compiler_params=pltpu.CompilerParams(
            dimension_semantics=("parallel",),
            vmem_limit_bytes=48 * 1024 * 1024),
    )(d_emb, u_emb, *weight_args)
    return out[:B]


def init_params(key, max_iid, max_uid, f_size, struct):
    """Deterministic parameter init mirroring the PyTorch __init__ shapes."""
    keys = jax.random.split(key, 2 + 2 * (len(struct) - 1))
    a = math.sqrt(2.0 / f_size)
    doc_embed = jax.random.uniform(keys[0], (max_iid + 1, f_size),
                                   minval=-a, maxval=a, dtype=jnp.float32)
    user_embed = jax.random.uniform(keys[1], (max_uid + 1, f_size),
                                    minval=-a, maxval=a, dtype=jnp.float32)
    mlp_params = []
    for i in range(len(struct) - 1):
        fan_in, fan_out = struct[i], struct[i + 1]
        # kaiming_uniform_ (gain=sqrt(2)): bound = sqrt(6 / fan_in)
        wb = math.sqrt(6.0 / fan_in)
        w = jax.random.uniform(keys[2 + 2 * i], (fan_in, fan_out),
                               minval=-wb, maxval=wb, dtype=jnp.float32)
        # nn.Linear default bias init: U(-1/sqrt(fan_in), 1/sqrt(fan_in))
        bb = 1.0 / math.sqrt(fan_in)
        b = jax.random.uniform(keys[3 + 2 * i], (1, fan_out),
                               minval=-bb, maxval=bb, dtype=jnp.float32)
        mlp_params.append((w, b))
    return doc_embed, user_embed, mlp_params


def reference_forward(slates, users, doc_embed, user_embed, mlp_params,
                      s_size, f_size):
    """Pure-JAX reference of the PyTorch forward (f32 math on given tables)."""
    B = slates.shape[0]
    d = jnp.take(doc_embed, slates, axis=0).reshape(
        (B, s_size * f_size)).astype(jnp.float32)
    d = d / jnp.maximum(jnp.linalg.norm(d, axis=1, keepdims=True), 1e-12)
    u = jnp.take(user_embed, users, axis=0).astype(jnp.float32)
    u = u / jnp.maximum(jnp.linalg.norm(u, axis=1, keepdims=True), 1e-12)
    h = jnp.concatenate([d, u], axis=1)
    for i, (w, b) in enumerate(mlp_params):
        h = h @ w + b
        if i < len(mlp_params) - 1:
            h = jnp.maximum(h, 0.0)
    return h


if __name__ == "__main__":
    # Small, forward-consistent shapes:
    #   slate size S=8, feature size F=16, hidden=32
    #   struct = [(S+1)*F, 32, S] = [144, 32, 8]  (no_user = False)
    S, F_ = 8, 16
    MAX_IID, MAX_UID = 50, 10
    STRUCT = [(S + 1) * F_, 32, S]

    key = jax.random.PRNGKey(0)
    k_param, k_slate, k_user = jax.random.split(key, 3)
    doc_embed, user_embed, mlp_params = init_params(
        k_param, MAX_IID, MAX_UID, F_, STRUCT)

    # Matched-precision reference tables (kernel gathers in bf16, computes f32).
    doc_bf = doc_embed.astype(jnp.bfloat16).astype(jnp.float32)
    usr_bf = user_embed.astype(jnp.bfloat16).astype(jnp.float32)

    ok = True

    # --- Test 1: tiny batch (single grid step) ---
    B = 2
    slates = jax.random.randint(k_slate, (B, S), 0, MAX_IID + 1, dtype=jnp.int32)
    users = jax.random.randint(k_user, (B,), 0, MAX_UID + 1, dtype=jnp.int32)
    fwd = functools.partial(user_response_mlp, s_size=S, f_size=F_)
    out = jax.block_until_ready(
        fwd(slates, users, doc_embed, user_embed, mlp_params))
    ref = reference_forward(slates, users, doc_bf, usr_bf, mlp_params, S, F_)
    ok &= out.shape == (B, S)
    ok &= bool(jnp.allclose(out, ref, atol=1e-4, rtol=1e-4))

    # --- Test 2: multi-step grid (forced small batch tile + ragged tail) ---
    B2 = 20
    k_s2, k_u2 = jax.random.split(jax.random.PRNGKey(1))
    slates2 = jax.random.randint(k_s2, (B2, S), 0, MAX_IID + 1, dtype=jnp.int32)
    users2 = jax.random.randint(k_u2, (B2,), 0, MAX_UID + 1, dtype=jnp.int32)
    out2 = jax.block_until_ready(
        user_response_mlp(slates2, users2, doc_embed, user_embed, mlp_params,
                          S, F_, max_batch_tile=8))
    ref2 = reference_forward(slates2, users2, doc_bf, usr_bf, mlp_params, S, F_)
    ok &= out2.shape == (B2, S)
    ok &= bool(jnp.allclose(out2, ref2, atol=1e-4, rtol=1e-4))

    assert ok, "kernel output mismatch vs reference"
    print("KERNEL_OK")
</pallas_src>

<mosaic_0001>
module attributes {stable_mosaic.version = 11 : i64} {
  func.func @_response_mlp_kernel(%arg0: i32, %arg1: memref<8x128xbf16, #tpu.memory_space<vmem>>, %arg2: memref<8x16xbf16, #tpu.memory_space<vmem>>, %arg3: memref<128x32xf32, #tpu.memory_space<vmem>>, %arg4: memref<16x32xf32, #tpu.memory_space<vmem>>, %arg5: memref<1x32xf32, #tpu.memory_space<vmem>>, %arg6: memref<32x8xf32, #tpu.memory_space<vmem>>, %arg7: memref<1x8xf32, #tpu.memory_space<vmem>>, %arg8: memref<8x8xf32, #tpu.memory_space<vmem>>) attributes {dimension_semantics = [#tpu.dimension_semantics<parallel>], iteration_bounds = array<i64: 1>, scalar_prefetch = 0 : i64, scratch_operands = 0 : i64, tpu.core_type = #tpu.core_type<tc>, window_params = [{transform_indices = @transform_0, window_bounds = array<i64: 8, 128>}, {transform_indices = @transform_1, window_bounds = array<i64: 8, 16>}, {pipeline_mode = #tpu.pipeline_mode<synchronous>, transform_indices = @transform_2, window_bounds = array<i64: 128, 32>}, {pipeline_mode = #tpu.pipeline_mode<synchronous>, transform_indices = @transform_3, window_bounds = array<i64: 16, 32>}, {pipeline_mode = #tpu.pipeline_mode<synchronous>, transform_indices = @transform_4, window_bounds = array<i64: 1, 32>}, {pipeline_mode = #tpu.pipeline_mode<synchronous>, transform_indices = @transform_5, window_bounds = array<i64: 32, 8>}, {pipeline_mode = #tpu.pipeline_mode<synchronous>, transform_indices = @transform_6, window_bounds = array<i64: 1, 8>}, {transform_indices = @transform_7, window_bounds = array<i64: 8, 8>}]} {
    %c0 = arith.constant 0 : index
    %c0_0 = arith.constant 0 : index
    %0 = vector.load %arg1[%c0, %c0_0] : memref<8x128xbf16, #tpu.memory_space<vmem>>, vector<8x128xbf16>
    %1 = arith.extf %0 : vector<8x128xbf16> to vector<8x128xf32>
    %c0_1 = arith.constant 0 : index
    %c0_2 = arith.constant 0 : index
    %2 = vector.load %arg2[%c0_1, %c0_2] : memref<8x16xbf16, #tpu.memory_space<vmem>>, vector<8x16xbf16>
    %3 = arith.extf %2 : vector<8x16xbf16> to vector<8x16xf32>
    %4 = arith.mulf %1, %1 : vector<8x128xf32>
    %cst = arith.constant dense<0.000000e+00> : vector<8xf32>
    %5 = vector.multi_reduction <add>, %4, %cst [1] : vector<8x128xf32> to vector<8xf32>
    %6 = vector.shape_cast %5 : vector<8xf32> to vector<8x1xf32>
    %cst_3 = arith.constant 1.000000e-24 : f32
    %7 = vector.broadcast %cst_3 : f32 to vector<8x1xf32>
    %8 = arith.maximumf %6, %7 : vector<8x1xf32>
    %9 = math.rsqrt %8 : vector<8x1xf32>
    %10 = arith.mulf %3, %3 : vector<8x16xf32>
    %cst_4 = arith.constant dense<0.000000e+00> : vector<8xf32>
    %11 = vector.multi_reduction <add>, %10, %cst_4 [1] : vector<8x16xf32> to vector<8xf32>
    %12 = vector.shape_cast %11 : vector<8xf32> to vector<8x1xf32>
    %cst_5 = arith.constant 1.000000e-24 : f32
    %13 = vector.broadcast %cst_5 : f32 to vector<8x1xf32>
    %14 = arith.maximumf %12, %13 : vector<8x1xf32>
    %15 = math.rsqrt %14 : vector<8x1xf32>
    %c0_6 = arith.constant 0 : index
    %c0_7 = arith.constant 0 : index
    %16 = vector.load %arg3[%c0_6, %c0_7] : memref<128x32xf32, #tpu.memory_space<vmem>>, vector<128x32xf32>
    %cst_8 = arith.constant dense<0.000000e+00> : vector<8x32xf32>
    %17 = tpu.matmul %1, %16, %cst_8 {dimension_numbers = #tpu.dot_dimension_numbers<[1], [0], [0], [1], [0, 0, 1, 1], [], []>} : vector<8x128xf32>, vector<128x32xf32>, vector<8x32xf32> -> vector<8x32xf32>
    %18 = vector.broadcast %9 : vector<8x1xf32> to vector<8x32xf32>
    %19 = arith.mulf %17, %18 : vector<8x32xf32>
    %c0_9 = arith.constant 0 : index
    %c0_10 = arith.constant 0 : index
    %20 = vector.load %arg4[%c0_9, %c0_10] : memref<16x32xf32, #tpu.memory_space<vmem>>, vector<16x32xf32>
    %cst_11 = arith.constant dense<0.000000e+00> : vector<8x32xf32>
    %21 = tpu.matmul %3, %20, %cst_11 {dimension_numbers = #tpu.dot_dimension_numbers<[1], [0], [0], [1], [0, 0, 1, 1], [], []>} : vector<8x16xf32>, vector<16x32xf32>, vector<8x32xf32> -> vector<8x32xf32>
    %22 = vector.broadcast %15 : vector<8x1xf32> to vector<8x32xf32>
    %23 = arith.mulf %21, %22 : vector<8x32xf32>
    %24 = arith.addf %19, %23 : vector<8x32xf32>
    %c0_12 = arith.constant 0 : index
    %c0_13 = arith.constant 0 : index
    %25 = vector.load %arg5[%c0_12, %c0_13] : memref<1x32xf32, #tpu.memory_space<vmem>>, vector<1x32xf32>
    %26 = vector.broadcast %25 : vector<1x32xf32> to vector<8x32xf32>
    %27 = arith.addf %24, %26 : vector<8x32xf32>
    %cst_14 = arith.constant 0.000000e+00 : f32
    %28 = vector.broadcast %cst_14 : f32 to vector<8x32xf32>
    %29 = arith.maximumf %27, %28 : vector<8x32xf32>
    %c0_15 = arith.constant 0 : index
    %c0_16 = arith.constant 0 : index
    %30 = vector.load %arg6[%c0_15, %c0_16] : memref<32x8xf32, #tpu.memory_space<vmem>>, vector<32x8xf32>
    %c0_17 = arith.constant 0 : index
    %c0_18 = arith.constant 0 : index
    %31 = vector.load %arg7[%c0_17, %c0_18] : memref<1x8xf32, #tpu.memory_space<vmem>>, vector<1x8xf32>
    %cst_19 = arith.constant dense<0.000000e+00> : vector<8x8xf32>
    %32 = tpu.matmul %29, %30, %cst_19 {dimension_numbers = #tpu.dot_dimension_numbers<[1], [0], [0], [1], [0, 0, 1, 1], [], []>} : vector<8x32xf32>, vector<32x8xf32>, vector<8x8xf32> -> vector<8x8xf32>
    %33 = vector.broadcast %31 : vector<1x8xf32> to vector<8x8xf32>
    %34 = arith.addf %32, %33 : vector<8x8xf32>
    %c0_20 = arith.constant 0 : index
    %c0_21 = arith.constant 0 : index
    %35 = vector.load %arg8[%c0_20, %c0_21] : memref<8x8xf32, #tpu.memory_space<vmem>>, vector<8x8xf32>
    tpu.vector_store %arg8[%c0_20, %c0_21], %34 {strides = array<i32>} : memref<8x8xf32, #tpu.memory_space<vmem>>, vector<8x8xf32>,
    return
  }
  func.func @transform_0(%arg0: i32) -> (i32, i32) {
    %c0_i32 = arith.constant 0 : i32
    %c0_i32_0 = arith.constant 0 : i32
    return %arg0, %c0_i32 : i32, i32
  }
  func.func @transform_1(%arg0: i32) -> (i32, i32) {
    %c0_i32 = arith.constant 0 : i32
    %c0_i32_0 = arith.constant 0 : i32
    return %arg0, %c0_i32 : i32, i32
  }
  func.func @transform_2(%arg0: i32) -> (i32, i32) {
    %c0_i32 = arith.constant 0 : i32
    %c0_i32_0 = arith.constant 0 : i32
    %c0_i32_1 = arith.constant 0 : i32
    return %c0_i32, %c0_i32_0 : i32, i32
  }
  func.func @transform_3(%arg0: i32) -> (i32, i32) {
    %c0_i32 = arith.constant 0 : i32
    %c0_i32_0 = arith.constant 0 : i32
    %c0_i32_1 = arith.constant 0 : i32
    return %c0_i32, %c0_i32_0 : i32, i32
  }
  func.func @transform_4(%arg0: i32) -> (i32, i32) {
    %c0_i32 = arith.constant 0 : i32
    %c0_i32_0 = arith.constant 0 : i32
    %c0_i32_1 = arith.constant 0 : i32
    return %c0_i32, %c0_i32_0 : i32, i32
  }
  func.func @transform_5(%arg0: i32) -> (i32, i32) {
    %c0_i32 = arith.constant 0 : i32
    %c0_i32_0 = arith.constant 0 : i32
    %c0_i32_1 = arith.constant 0 : i32
    return %c0_i32, %c0_i32_0 : i32, i32
  }
  func.func @transform_6(%arg0: i32) -> (i32, i32) {
    %c0_i32 = arith.constant 0 : i32
    %c0_i32_0 = arith.constant 0 : i32
    %c0_i32_1 = arith.constant 0 : i32
    return %c0_i32, %c0_i32_0 : i32, i32
  }
  func.func @transform_7(%arg0: i32) -> (i32, i32) {
    %c0_i32 = arith.constant 0 : i32
    %c0_i32_0 = arith.constant 0 : i32
    return %arg0, %c0_i32 : i32, i32
  }
}

</mosaic_0001>

<bundles_post_ra>
// kernel: tpu_custom_call.1
= control target key start
LH: loop header
LB: loop body
LE: loop exit
PB: predicated region body
PF: predicated region fallthrough
CT: control target
= control target key end

     0   :  { %v464_v3 = vmov 0.0|0.0   ;;  %vm465_vm0 = vmmov 0   ;;  %v466_v6 = vmov 0.0   ;;  %s612_s0 = inlined_call_operand.vmem [shape: bf16[8,128], index: 0, kind: input, shape index: {}]   ;;  %s613_s1 = inlined_call_operand.vmem [shape: bf16[8,16], index: 1, kind: input, shape index: {}]   ;;  %s614_s2 = inlined_call_operand.vmem [shape: f32[128,32], index: 2, kind: input, shape index: {}]   ;;  %s615_s3 = inlined_call_operand.vmem [shape: f32[16,32], index: 3, kind: input, shape index: {}]   ;;  %s616_s4 = inlined_call_operand.vmem [shape: f32[1,32], index: 4, kind: input, shape index: {}]   ;;  %s617_s5 = inlined_call_operand.vmem [shape: f32[32,8], index: 5, kind: input, shape index: {}]   ;;  %s618_s6 = inlined_call_operand.vmem [shape: f32[1,8], index: 6, kind: input, shape index: {}]   ;;  %s619_s7 = inlined_call_operand.hbm [shape: f32[8,8], index: 7, kind: output, shape index: {}]  }
   0x1   :  { %v43_v0 = vld [vmem:[%s614_s2] sm:$0xff]  ;;  %v44_v1 = vld [vmem:[%s614_s2 + $0x8] sm:$0xff]  ;;  %v45_v2 = vld [vmem:[%s614_s2 + $0x10] sm:$0xff]  ;;  %399 = vmatprep.subr.bf16.mxu0 %v464_v3  ;;  %423 = vmatprep.subr.bf16.mxu1 %v464_v3 }
   0x2   :  { %v400_v4 = vpack.c.bf16 %v44_v1, %v43_v0  ;;  %v46_v5 = vld [vmem:[%s614_s2 + $0x18] sm:$0xff]  ;;  %385 = vmatprep.mubr.msk.f32.mxu1 %vm465_vm0, %v466_v6  ;;  %378 = vmatprep.mubr.msk.f32.mxu0 %vm465_vm0, %v466_v6  ;;  %v47_v8 = vld [vmem:[%s614_s2 + $0x20] sm:$0xff]  ;;  %v48_v9 = vld [vmem:[%s614_s2 + $0x28] sm:$0xff] }
   0x3   :  { %v403_v7 = vpack.c.bf16 %v46_v5, %v45_v2  ;;  %v130_v10 = vld [vmem:[%s615_s3] sm:$0xff]  ;;  %v131_v11 = vld [vmem:[%s615_s3 + $0x8] sm:$0xff] }
   0x4   :  { %401 = vmatpush3.bf16.msra.mxu0 %v400_v4  ;;  %v424_v12 = vpack.c.bf16 %v131_v11, %v130_v10  ;;  %v29_v13 = vld [vmem:[%s613_s1] sm:$0xf] }
   0x5   :  { %402 = vmatprep.subr.bf16.mxu0 %v464_v3  ;;  %v27_v14 = vld [vmem:[%s612_s0] sm:$0xf] }
   0x6   :  { %12 = vsyncpa [#allocation3], 0  ;;  %v406_v15 = vpack.c.bf16 %v48_v9, %v47_v8  ;;  %v30_v16 = vunpack.c.l.bf16 %v29_v13  ;;  %v28_v17 = vunpack.c.l.bf16 %v27_v14  ;;  %v49_v18 = vld [vmem:[%s614_s2 + $0x30] sm:$0xff]  ;;  %v50_v19 = vld [vmem:[%s614_s2 + $0x38] sm:$0xff]  ;;  %425 = vmatpush3.bf16.msra.mxu1 %v424_v12  ;;  %vm37_vm1 = vcmask 130048   ;;  %s467_s0 = smov [#allocation2]  }
   0x7   :  { %426 = vmatprep.subr.bf16.mxu1 %v464_v3  ;;  %v409_v22 = vpack.c.bf16 %v50_v19, %v49_v18  ;;  %v51_v23 = vld [vmem:[%s614_s2 + $0x40] sm:$0xff]  ;;  %v52_v24 = vld [vmem:[%s614_s2 + $0x48] sm:$0xff]  ;;  %v53_v27 = vld [vmem:[%s614_s2 + $0x50] sm:$0xff]  ;;  %vm227_vm2 = vcmask 261120   ;;  %s309_s1 = sshll.u32 %s467_s0, 4  ;;  %vm301_vm3 = vcmask 64512   ;;  %s310_s1 = int_to_ptr.vmem [resolvable:$true] %s309_s1 }
   0x8   :  { %404 = vmatpush3.bf16.msra.mxu0 %v403_v7  ;;  %v31_v20 = vmul.f32 %v28_v17, %v28_v17  ;;  %v36_v21 = vmul.f32 %v30_v16, %v30_v16  ;;  %v412_v26 = vpack.c.bf16 %v52_v24, %v51_v23  ;;  %v54_v28 = vld [vmem:[%s614_s2 + $0x58] sm:$0xff]  ;;  %v55_v30 = vld [vmem:[%s614_s2 + $0x60] sm:$0xff]  ;;  %v56_v31 = vld [vmem:[%s614_s2 + $0x68] sm:$0xff]  ;;  %s440_s24 = scalar_lea.vmem %s310_s1, 128  ;;  %p445_p1 = scmp.lt.s32.totalorder %s310_s1, %s310_s1 }
   0x9   :  { %405 = vmatprep.subr.bf16.mxu0 %v464_v3  ;;  %386 = vmatmul.mubr.msk.f32.vlgmr.msra.gmra.mrb[0].mxu1 %vm37_vm1, %v30_v16  ;;  %v415_v29 = vpack.c.bf16 %v54_v28, %v53_v27  ;;  %v418_v32 = vpack.c.bf16 %v56_v31, %v55_v30  ;;  %v57_v33 = vld [vmem:[%s614_s2 + $0x70] sm:$0xff]  ;;  %v58_v34 = vld [vmem:[%s614_s2 + $0x78] sm:$0xff]  ;;  %v216_v36 = vld [vmem:[%s617_s5] sm:$0xff]  ;;  %p441_p0 = scmp.ne.s32.totalorder %s310_s1, %s440_s24  ;;  %p446_p2 = scmp.lt.s32.totalorder %s440_s24, %s440_s24 }
   0xa   :  { %32 = vadd.xlane.f32.xlu0 %v31_v20  ;;  %v38_v25 = vsel %vm37_vm1, %v36_v21, 0.0  ;;  %396 = vmatprep.mubr.msk.f32.mxu1 %vm465_vm0, %v466_v6  ;;  %v421_v35 = vpack.c.bf16 %v58_v34, %v57_v33  ;;  %v217_v37 = vld [vmem:[%s617_s5 + $0x8] sm:$0xff]  ;;  %v218_v39 = vld [vmem:[%s617_s5 + $0x10] sm:$0xff]  ;;  %v219_v40 = vld [vmem:[%s617_s5 + $0x18] sm:$0xff] }
   0xb   :  { %v427_v38 = vpack.c.bf16 %v217_v37, %v216_v36  ;;  %v430_v41 = vpack.c.bf16 %v219_v40, %v218_v39  ;;  %v318_v54 = vld [vmem:[%s616_s4] ss:$0 sm:$0xff]  ;;  %p447_p3 = por %p446_p2, %p445_p1 }
   0xc   :  { %407 = vmatpush3.bf16.msra.mxu0 %v406_v15  ;;  %v319_v58 = vld [vmem:[%s618_s6] ss:$0 sm:$0xff] }
   0xd   :  { %408 = vmatprep.subr.bf16.mxu0 %v464_v3  ;;  %428 = vmatpush3.bf16.msra.mxu1 %v427_v38  ;;  %p448_p4 = pnand %p447_p3, %p441_p0 }
   0xe   :  { %39 = vadd.xlane.f32.xlu0 %v38_v25  ;;  %429 = vmatprep.subr.bf16.mxu1 %v464_v3 }
  0x10   :  { %410 = vmatpush3.bf16.msra.mxu0 %v409_v22 }
  0x11   :  { %411 = vmatprep.subr.bf16.mxu0 %v464_v3  ;;  %431 = vmatpush3.bf16.msra.mxu1 %v430_v41 }
  0x14   :  { %413 = vmatpush3.bf16.msra.mxu0 %v412_v26 }
  0x15   :  { %414 = vmatprep.subr.bf16.mxu0 %v464_v3 }
  0x18   :  { %416 = vmatpush3.bf16.msra.mxu0 %v415_v29 }
  0x19   :  { %417 = vmatprep.subr.bf16.mxu0 %v464_v3 }
  0x1c   :  { %419 = vmatpush3.bf16.msra.mxu0 %v418_v32 }
  0x1d   :  { %420 = vmatprep.subr.bf16.mxu0 %v464_v3 }
  0x20   :  { %422 = vmatpush3.bf16.msra.mxu0 %v421_v35 }
  0x23   :  { %379 = vmatmul.mubr.f32.vlgmr.msra.gmra.mrb[0].mxu0 %v28_v17 }
  0x97   :  { %v33_v42 = vpop.xlane.xlu0 %32 }
  0x98   :  { %v34_v47 = vmax.f32 %v33_v42, 1e-24 }
  0x9b   :  { %v40_v45 = vpop.xlane.xlu0 %39 }
  0x9c   :  { %v41_v46 = vmax.f32 %v40_v45, 1e-24 }
  0x9e   :  { %436 = vrsqrt.f32 %v41_v46 }
  0x9f   :  { %438 = vrsqrt.f32 %v34_v47 }
  0xa8   :  { %v437_v48 = vpop.eup %436 }
  0xa9   :  { %v439_v50 = vpop.eup %438 }
  0xdc   :  { %v201_v43 = vpop.f32.mrb[0].mxu1 }
  0xdd   :  { %v387_v44 = vpop.f32.mrb[1].mxu1  ;;  %v205_v49 = vmul.f32 %v437_v48, %v201_v43 }
  0xf6   :  { %v125_v51 = vpop.f32.mrb[0].mxu0 }
  0xf7   :  { %v129_v52 = vmul.f32 %v439_v50, %v125_v51  ;;  %v380_v53 = vpop.f32.mrb[1].mxu0 }
  0xf9   :  { %v206_v55 = vadd.f32 %v205_v49, %v129_v52 }
  0xfb   :  { %v214_v56 = vadd.f32 %v318_v54, %v206_v55 }
  0xfd   :  { %v215_v57 = vmax.f32 %v214_v56, 0.0 }
  0xff   :  { %397 = vmatmul.mubr.msk.f32.vlgmr.msra.gmra.mrb[2].mxu1 %vm227_vm2, %v215_v57 }
 0x1d2   :  { %v297_v59 = vpop.f32.mrb[2].mxu1 }
 0x1d3   :  { %v298_v60 = vadd.f32 %v319_v58, %v297_v59  ;;  %v398_v61 = vpop.f32.mrb[3].mxu1 }
 0x1d5   :  { %302 = vst.msk [vmem:[#allocation2] sm:$0xff] %vm301_vm3, %v298_v60 }
 0x1d6   :  { %451 = shalt.err (!%p448_p4)
}
 0x1d7   :  { %s452_s26 = scalar_lea.hbm %s619_s7, 128 }
 0x1d8   :  { %p453_p5 = scmp.ne.s32.totalorder %s619_s7, %s452_s26  ;;  %p456_p6 = scmp.lt.u32.totalorder %s452_s26, %s619_s7 }
 0x1da   :  { %p458_p7 = pnand %p456_p6, %p453_p5 }
 0x1dc   :  { %461 = shalt.err (!%p458_p7)
}
 0x1dd   :  { %312 = dma.vmem_to_hbm [thread:$0]  %s310_s1, 128, %s619_s7, [#allocation3]  }
 0x1de   :  { %462 = dma.done.wait [#allocation3], 128  }
 0x1df   :  { %463 = vsyncadd [#allocation3], 4294967168 }
 0x1e0   :  { %316 = vsyncpa [#allocation3], 1 }

</bundles_post_ra>
